<compile_context>
chip_gen: v6e
topology: v6e:2x2x1
jax: 0.10.0
libtpu: 0.0.40
codegen_flags: <defaults>
</compile_context>

<pallas_src>
import functools

import jax
import jax.numpy as jnp
from jax import lax
from jax.experimental import pallas as pl
from jax.experimental.pallas import tpu as pltpu

_LANES = 128
_SUBLANES = 8


def _round_up(n, m):
    return ((n + m - 1) // m) * m


def _net_kernel(x_ref, ws_ref, bs_ref, wh_ref, bh_ref, p_ref, b_ref, *,
                outdim_policy, outdim_baseline):
    # shared = relu(x @ Ws + bs); accumulation and epilogue in f32 on all generations.
    h = jnp.dot(x_ref[...], ws_ref[...],
                preferred_element_type=jnp.float32) + bs_ref[...]
    h = jnp.maximum(h, 0.0)

    # One fused head matmul: packed [policy | baseline | zero-pad] -> 128 lanes.
    heads = jnp.dot(h.astype(wh_ref.dtype), wh_ref[...],
                    preferred_element_type=jnp.float32) + bh_ref[...]

    col = lax.broadcasted_iota(jnp.int32, heads.shape, 1)
    is_policy = col < outdim_policy

    # Masked softmax over the policy lanes only.  Exact divide (not approx
    # reciprocal): the kernel is HBM-bound so this is free and keeps sum(p) == 1.
    logits = jnp.where(is_policy, heads, -jnp.inf)
    m = jnp.max(logits, axis=-1, keepdims=True)
    e = jnp.where(is_policy, jnp.exp(logits - m), 0.0)
    denom = jnp.sum(e, axis=-1, keepdims=True)
    probs = e / denom

    # Narrow stores: only the useful lanes go back to HBM (masked vst, but ~25x
    # less writeback than a 128-lane f32 slab -> the dominant byte saving here).
    p_ref[...] = probs[:, :outdim_policy].astype(p_ref.dtype)
    b_ref[...] = heads[:, outdim_policy:outdim_policy + outdim_baseline].astype(b_ref.dtype)


def pack_params(params, compute_dtype=jnp.bfloat16):
    """One-time parameter prep: pack both heads into a single lane-dense, zero-padded
    (hidden, 128) weight and cast weights to compute_dtype.  Kept OFF the per-call
    path so the scatter/cast XLA ops do not run on every forward."""
    ws, bs = params["ws"], params["bs"]
    wp, bp = params["wp"], params["bp"]
    wb, bb = params["wb"], params["bb"]
    hidden_dim = ws.shape[1]
    P = wp.shape[1]           # outdim_policy
    Bo = wb.shape[1]          # outdim_baseline
    out_lanes = _round_up(P + Bo, _LANES)

    w_heads = jnp.zeros((hidden_dim, out_lanes), compute_dtype)
    w_heads = w_heads.at[:, :P].set(wp.astype(compute_dtype))
    w_heads = w_heads.at[:, P:P + Bo].set(wb.astype(compute_dtype))
    b_heads = jnp.zeros((1, out_lanes), jnp.float32)
    b_heads = b_heads.at[:, :P].set(bp.astype(jnp.float32))
    b_heads = b_heads.at[:, P:P + Bo].set(bb.astype(jnp.float32))

    return {
        "ws": ws.astype(compute_dtype),
        "bs": bs.astype(jnp.float32),
        "w_heads": w_heads,
        "b_heads": b_heads,
        "outdim_policy": P,
        "outdim_baseline": Bo,
        "compute_dtype": compute_dtype,
    }


def net_forward(x, packed, *, block_batch=2048):
    """x: (B, input_dim).  packed: output of pack_params().  Returns (probs, baseline)."""
    ws, bs = packed["ws"], packed["bs"]
    w_heads, b_heads = packed["w_heads"], packed["b_heads"]
    P = packed["outdim_policy"]
    Bo = packed["outdim_baseline"]
    compute_dtype = packed["compute_dtype"]

    B, input_dim = x.shape
    hidden_dim = ws.shape[1]
    out_lanes = w_heads.shape[1]

    # Batch tiling: sublane-aligned tile; for larger batches force >= 2 tiles so the
    # ("parallel",) grid can shard across both TensorCores on v7x.
    b_pad = _round_up(B, _SUBLANES)
    n_tiles = pl.cdiv(B, block_batch)
    if B > 2 * _SUBLANES and n_tiles < 2:
        n_tiles = 2
    tb = min(_round_up(pl.cdiv(b_pad, n_tiles), _SUBLANES), b_pad)
    grid = (pl.cdiv(b_pad, tb),)

    # Pad only to the sublane multiple (8); cdiv grid handles a ragged last block,
    # so there is no full re-materialization of x to a tile multiple.
    if b_pad != B:
        x = jnp.pad(x, ((0, b_pad - B), (0, 0)))
    x_c = x.astype(compute_dtype)

    kernel = functools.partial(_net_kernel, outdim_policy=P, outdim_baseline=Bo)

    p_out, b_out = pl.pallas_call(
        kernel,
        out_shape=(jax.ShapeDtypeStruct((b_pad, P), jnp.float32),
                   jax.ShapeDtypeStruct((b_pad, Bo), jnp.float32)),
        grid_spec=pltpu.PrefetchScalarGridSpec(
            num_scalar_prefetch=0,
            grid=grid,
            in_specs=[
                # batch-tiled activations
                pl.BlockSpec((tb, input_dim), lambda i: (i, 0)),
                # weights / biases: full resident blocks, shared across grid steps
                pl.BlockSpec((input_dim, hidden_dim), lambda i: (0, 0)),
                pl.BlockSpec((1, hidden_dim), lambda i: (0, 0)),
                pl.BlockSpec((hidden_dim, out_lanes), lambda i: (0, 0)),
                pl.BlockSpec((1, out_lanes), lambda i: (0, 0)),
            ],
            out_specs=[
                pl.BlockSpec((tb, P), lambda i: (i, 0)),
                pl.BlockSpec((tb, Bo), lambda i: (i, 0)),
            ],
        ),
        compiler_params=pltpu.CompilerParams(
            # Batch tiles are independent -> shard across both TCs on v7x.
            dimension_semantics=("parallel",),
            # Headroom against v7x's 64 MiB physical VMEM; plenty for these tiles.
            vmem_limit_bytes=32 * 1024 * 1024,
        ),
    )(x_c, ws, bs, w_heads, b_heads)

    if b_pad != B:
        return p_out[:B], b_out[:B]
    return p_out, b_out


def init_params(key, input_dim, hidden_dim, outdim_policy, outdim_baseline):
    """Deterministic init mimicking nn.Linear's U(-1/sqrt(fan_in), 1/sqrt(fan_in))."""
    ks = jax.random.split(key, 6)

    def lin(kw, kb, fan_in, fan_out):
        bound = 1.0 / jnp.sqrt(jnp.float32(fan_in))
        w = jax.random.uniform(kw, (fan_in, fan_out), jnp.float32, -bound, bound)
        b = jax.random.uniform(kb, (1, fan_out), jnp.float32, -bound, bound)
        return w, b

    ws, bs = lin(ks[0], ks[1], input_dim, hidden_dim)
    wp, bp = lin(ks[2], ks[3], hidden_dim, outdim_policy)
    wb, bb = lin(ks[4], ks[5], hidden_dim, outdim_baseline)
    return {"ws": ws, "bs": bs, "wp": wp, "bp": bp, "wb": wb, "bb": bb}


def _reference(x, params):
    h = jnp.maximum(x @ params["ws"] + params["bs"], 0.0)
    logits = h @ params["wp"] + params["bp"]
    p = jax.nn.softmax(logits, axis=-1)
    b = h @ params["wb"] + params["bb"]
    return p, b


if __name__ == "__main__":
    # Small shapes consistent with the module: batch=8, input_dim=16,
    # hidden_dim=32, outdim_policy=4, outdim_baseline=1.
    key = jax.random.PRNGKey(0)
    k_x, k_p, k_x2 = jax.random.split(key, 3)
    B, input_dim, hidden_dim, outdim_policy, outdim_baseline = 8, 16, 32, 4, 1

    x = jax.random.normal(k_x, (B, input_dim), jnp.float32)
    params = init_params(k_p, input_dim, hidden_dim, outdim_policy, outdim_baseline)
    p_ref, b_ref = _reference(x, params)

    # --- f32 compute path: tight tolerances ---
    packed_f32 = pack_params(params, compute_dtype=jnp.float32)
    p_out, b_out = net_forward(x, packed_f32)
    jax.block_until_ready((p_out, b_out))
    assert p_out.shape == (B, outdim_policy) and b_out.shape == (B, outdim_baseline)
    assert jnp.allclose(p_out, p_ref, atol=2e-3, rtol=2e-3)
    assert jnp.allclose(b_out, b_ref, atol=2e-3, rtol=2e-3)
    assert jnp.allclose(jnp.sum(p_out, axis=-1), 1.0, atol=1e-4)

    # --- bf16 compute path (default): halves DMA bytes; looser tolerances ---
    packed_bf16 = pack_params(params)  # compute_dtype=bf16 by default
    p16, b16 = net_forward(x, packed_bf16)
    jax.block_until_ready((p16, b16))
    assert jnp.allclose(p16, p_ref, atol=2e-2, rtol=2e-2)
    assert jnp.allclose(b16, b_ref, atol=5e-2, rtol=5e-2)
    assert jnp.allclose(jnp.sum(p16, axis=-1), 1.0, atol=1e-3)

    # --- multi-tile grid path (B not a sublane multiple, several batch tiles) ---
    B2 = 20
    x2 = jax.random.normal(k_x2, (B2, input_dim), jnp.float32)
    p2, b2 = net_forward(x2, packed_f32, block_batch=8)
    jax.block_until_ready((p2, b2))
    p2_ref, b2_ref = _reference(x2, params)
    assert p2.shape == (B2, outdim_policy) and b2.shape == (B2, outdim_baseline)
    assert jnp.allclose(p2, p2_ref, atol=2e-3, rtol=2e-3)
    assert jnp.allclose(b2, b2_ref, atol=2e-3, rtol=2e-3)
    assert jnp.allclose(jnp.sum(p2, axis=-1), 1.0, atol=1e-4)

    print("KERNEL_OK")
</pallas_src>

<mosaic_0001>
module attributes {stable_mosaic.version = 11 : i64} {
  func.func @_net_kernel(%arg0: i32, %arg1: memref<8x16xf32, #tpu.memory_space<vmem>>, %arg2: memref<16x32xf32, #tpu.memory_space<vmem>>, %arg3: memref<1x32xf32, #tpu.memory_space<vmem>>, %arg4: memref<32x128xf32, #tpu.memory_space<vmem>>, %arg5: memref<1x128xf32, #tpu.memory_space<vmem>>, %arg6: memref<8x4xf32, #tpu.memory_space<vmem>>, %arg7: memref<8x1xf32, #tpu.memory_space<vmem>>) attributes {dimension_semantics = [#tpu.dimension_semantics<parallel>], iteration_bounds = array<i64: 1>, scalar_prefetch = 0 : i64, scratch_operands = 0 : i64, tpu.core_type = #tpu.core_type<tc>, window_params = [{transform_indices = @transform_0, window_bounds = array<i64: 8, 16>}, {pipeline_mode = #tpu.pipeline_mode<synchronous>, transform_indices = @transform_1, window_bounds = array<i64: 16, 32>}, {pipeline_mode = #tpu.pipeline_mode<synchronous>, transform_indices = @transform_2, window_bounds = array<i64: 1, 32>}, {pipeline_mode = #tpu.pipeline_mode<synchronous>, transform_indices = @transform_3, window_bounds = array<i64: 32, 128>}, {pipeline_mode = #tpu.pipeline_mode<synchronous>, transform_indices = @transform_4, window_bounds = array<i64: 1, 128>}, {transform_indices = @transform_5, window_bounds = array<i64: 8, 4>}, {transform_indices = @transform_6, window_bounds = array<i64: 8, 1>}]} {
    %c0 = arith.constant 0 : index
    %c0_0 = arith.constant 0 : index
    %0 = vector.load %arg1[%c0, %c0_0] : memref<8x16xf32, #tpu.memory_space<vmem>>, vector<8x16xf32>
    %c0_1 = arith.constant 0 : index
    %c0_2 = arith.constant 0 : index
    %1 = vector.load %arg2[%c0_1, %c0_2] : memref<16x32xf32, #tpu.memory_space<vmem>>, vector<16x32xf32>
    %cst = arith.constant dense<0.000000e+00> : vector<8x32xf32>
    %2 = tpu.matmul %0, %1, %cst {dimension_numbers = #tpu.dot_dimension_numbers<[1], [0], [0], [1], [0, 0, 1, 1], [], []>} : vector<8x16xf32>, vector<16x32xf32>, vector<8x32xf32> -> vector<8x32xf32>
    %c0_3 = arith.constant 0 : index
    %c0_4 = arith.constant 0 : index
    %3 = vector.load %arg3[%c0_3, %c0_4] : memref<1x32xf32, #tpu.memory_space<vmem>>, vector<1x32xf32>
    %4 = vector.broadcast %3 : vector<1x32xf32> to vector<8x32xf32>
    %5 = arith.addf %2, %4 : vector<8x32xf32>
    %cst_5 = arith.constant 0.000000e+00 : f32
    %6 = vector.broadcast %cst_5 : f32 to vector<8x32xf32>
    %7 = arith.maximumf %5, %6 : vector<8x32xf32>
    %c0_6 = arith.constant 0 : index
    %c0_7 = arith.constant 0 : index
    %8 = vector.load %arg4[%c0_6, %c0_7] : memref<32x128xf32, #tpu.memory_space<vmem>>, vector<32x128xf32>
    %cst_8 = arith.constant dense<0.000000e+00> : vector<8x128xf32>
    %9 = tpu.matmul %7, %8, %cst_8 {dimension_numbers = #tpu.dot_dimension_numbers<[1], [0], [0], [1], [0, 0, 1, 1], [], []>} : vector<8x32xf32>, vector<32x128xf32>, vector<8x128xf32> -> vector<8x128xf32>
    %c0_9 = arith.constant 0 : index
    %c0_10 = arith.constant 0 : index
    %10 = vector.load %arg5[%c0_9, %c0_10] : memref<1x128xf32, #tpu.memory_space<vmem>>, vector<1x128xf32>
    %11 = vector.broadcast %10 : vector<1x128xf32> to vector<8x128xf32>
    %12 = arith.addf %9, %11 : vector<8x128xf32>
    %13 = tpu.iota {dimensions = array<i32: 1>} : vector<8x128xi32>
    %c4_i32 = arith.constant 4 : i32
    %14 = vector.broadcast %c4_i32 : i32 to vector<8x128xi32>
    %15 = arith.cmpi slt, %13, %14 : vector<8x128xi32>
    %cst_11 = arith.constant 0xFF800000 : f32
    %16 = vector.broadcast %cst_11 : f32 to vector<8x128xf32>
    %17 = arith.select %15, %12, %16 : vector<8x128xi1>, vector<8x128xf32>
    %cst_12 = arith.constant dense<0xFF800000> : vector<8xf32>
    %18 = vector.multi_reduction <maximumf>, %17, %cst_12 [1] : vector<8x128xf32> to vector<8xf32>
    %19 = vector.shape_cast %18 : vector<8xf32> to vector<8x1xf32>
    %20 = vector.broadcast %19 : vector<8x1xf32> to vector<8x128xf32>
    %21 = arith.subf %17, %20 : vector<8x128xf32>
    %22 = math.exp %21 : vector<8x128xf32>
    %cst_13 = arith.constant 0.000000e+00 : f32
    %23 = vector.broadcast %cst_13 : f32 to vector<8x128xf32>
    %24 = arith.select %15, %22, %23 : vector<8x128xi1>, vector<8x128xf32>
    %cst_14 = arith.constant dense<0.000000e+00> : vector<8xf32>
    %25 = vector.multi_reduction <add>, %24, %cst_14 [1] : vector<8x128xf32> to vector<8xf32>
    %26 = vector.shape_cast %25 : vector<8xf32> to vector<8x1xf32>
    %27 = vector.broadcast %26 : vector<8x1xf32> to vector<8x128xf32>
    %28 = arith.divf %24, %27 : vector<8x128xf32>
    %29 = vector.extract_strided_slice %28 {offsets = [0, 0], sizes = [8, 4], strides = [1, 1]} : vector<8x128xf32> to vector<8x4xf32>
    %c0_15 = arith.constant 0 : index
    %c0_16 = arith.constant 0 : index
    %30 = vector.load %arg6[%c0_15, %c0_16] : memref<8x4xf32, #tpu.memory_space<vmem>>, vector<8x4xf32>
    tpu.vector_store %arg6[%c0_15, %c0_16], %29 {strides = array<i32>} : memref<8x4xf32, #tpu.memory_space<vmem>>, vector<8x4xf32>,
    %31 = vector.extract_strided_slice %12 {offsets = [0, 4], sizes = [8, 1], strides = [1, 1]} : vector<8x128xf32> to vector<8x1xf32>
    %c0_17 = arith.constant 0 : index
    %c0_18 = arith.constant 0 : index
    %32 = vector.load %arg7[%c0_17, %c0_18] : memref<8x1xf32, #tpu.memory_space<vmem>>, vector<8x1xf32>
    tpu.vector_store %arg7[%c0_17, %c0_18], %31 {strides = array<i32>} : memref<8x1xf32, #tpu.memory_space<vmem>>, vector<8x1xf32>,
    return
  }
  func.func @transform_0(%arg0: i32) -> (i32, i32) {
    %c0_i32 = arith.constant 0 : i32
    %c0_i32_0 = arith.constant 0 : i32
    return %arg0, %c0_i32 : i32, i32
  }
  func.func @transform_1(%arg0: i32) -> (i32, i32) {
    %c0_i32 = arith.constant 0 : i32
    %c0_i32_0 = arith.constant 0 : i32
    %c0_i32_1 = arith.constant 0 : i32
    return %c0_i32, %c0_i32_0 : i32, i32
  }
  func.func @transform_2(%arg0: i32) -> (i32, i32) {
    %c0_i32 = arith.constant 0 : i32
    %c0_i32_0 = arith.constant 0 : i32
    %c0_i32_1 = arith.constant 0 : i32
    return %c0_i32, %c0_i32_0 : i32, i32
  }
  func.func @transform_3(%arg0: i32) -> (i32, i32) {
    %c0_i32 = arith.constant 0 : i32
    %c0_i32_0 = arith.constant 0 : i32
    %c0_i32_1 = arith.constant 0 : i32
    return %c0_i32, %c0_i32_0 : i32, i32
  }
  func.func @transform_4(%arg0: i32) -> (i32, i32) {
    %c0_i32 = arith.constant 0 : i32
    %c0_i32_0 = arith.constant 0 : i32
    %c0_i32_1 = arith.constant 0 : i32
    return %c0_i32, %c0_i32_0 : i32, i32
  }
  func.func @transform_5(%arg0: i32) -> (i32, i32) {
    %c0_i32 = arith.constant 0 : i32
    %c0_i32_0 = arith.constant 0 : i32
    return %arg0, %c0_i32 : i32, i32
  }
  func.func @transform_6(%arg0: i32) -> (i32, i32) {
    %c0_i32 = arith.constant 0 : i32
    %c0_i32_0 = arith.constant 0 : i32
    return %arg0, %c0_i32 : i32, i32
  }
}

</mosaic_0001>

<bundles_post_ra>
// kernel: tpu_custom_call.1
= control target key start
LH: loop header
LB: loop body
LE: loop exit
PB: predicated region body
PF: predicated region fallthrough
CT: control target
= control target key end

     0   :  { %12 = vsyncpa [#allocation3], 0  ;;  %s433_s0 = inlined_call_operand.hbm [shape: f32[8,16], index: 0, kind: input, shape index: {}]   ;;  %s434_s1 = inlined_call_operand.hbm [shape: f32[16,32], index: 1, kind: input, shape index: {}]   ;;  %s435_s2 = inlined_call_operand.vmem [shape: f32[1,32], index: 2, kind: input, shape index: {}]   ;;  %s436_s3 = inlined_call_operand.hbm [shape: f32[32,128], index: 3, kind: input, shape index: {}]   ;;  %s437_s4 = inlined_call_operand.vmem [shape: f32[1,128], index: 4, kind: input, shape index: {}]   ;;  %s438_s5 = inlined_call_operand.vmem [shape: f32[8,4], index: 5, kind: output, shape index: {0}]   ;;  %s439_s6 = inlined_call_operand.vmem [shape: f32[8,1], index: 6, kind: output, shape index: {1}]  }
   0x1   :  { %13 = vsyncpa [#allocation5], 0  ;;  %s369_s21 = smov [#allocation4]  }
   0x2   :  { %s29_s22 = sshll.u32 %s369_s21, 4  ;;  %s30_s22 = int_to_ptr.vmem [resolvable:$true] %s29_s22 }
   0x3   :  { %s313_s23 = scalar_lea.vmem %s30_s22, 256  ;;  %p318_p1 = scmp.lt.s32.totalorder %s30_s22, %s30_s22 }
   0x4   :  { %p314_p0 = scmp.ne.s32.totalorder %s30_s22, %s313_s23  ;;  %p319_p2 = scmp.lt.s32.totalorder %s313_s23, %s313_s23 }
   0x6   :  { %p320_p3 = por %p319_p2, %p318_p1 }
   0x8   :  { %p321_p4 = pnand %p320_p3, %p314_p0 }
   0xa   :  { %324 = shalt.err (!%p321_p4)
}
   0xb   :  { %s370_s24 = smov 128   ;;  %s371_s25 = smov 8  }
   0xc   :  { %35 = dma.hbm_to_vmem [thread:$0]  %s434_s1, 256, %s30_s22, [#allocation5], %s370_s24, %s370_s24, %s371_s25  }
   0xd   :  { %s372_s28 = smov [#allocation2]   ;;  %s373_s30 = smov [#allocation6]  }
   0xe   :  { %s20_s29 = sshll.u32 %s372_s28, 4  ;;  %s43_s7 = sshll.u32 %s373_s30, 4  ;;  %s21_s29 = int_to_ptr.vmem [resolvable:$true] %s20_s29  ;;  %s44_s7 = int_to_ptr.vmem [resolvable:$true] %s43_s7 }
   0xf   :  { %s333_s8 = scalar_lea.vmem %s21_s29, 128  ;;  %p338_p6 = scmp.lt.s32.totalorder %s21_s29, %s21_s29 }
  0x10   :  { %p334_p5 = scmp.ne.s32.totalorder %s21_s29, %s333_s8  ;;  %p339_p7 = scmp.lt.s32.totalorder %s333_s8, %s333_s8 }
  0x12   :  { %p340_p8 = por %p339_p7, %p338_p6 }
  0x14   :  { %p341_p9 = pnand %p340_p8, %p334_p5 }
  0x16   :  { %344 = shalt.err (!%p341_p9)
}
  0x17   :  { %23 = dma.hbm_to_vmem [thread:$0]  %s433_s0, 128, %s21_s29, [#allocation3]  }
  0x18   :  { %s353_s11 = scalar_lea.vmem %s44_s7, 512  ;;  %p358_p11 = scmp.lt.s32.totalorder %s44_s7, %s44_s7 }
  0x19   :  { %p354_p10 = scmp.ne.s32.totalorder %s44_s7, %s353_s11  ;;  %p359_p12 = scmp.lt.s32.totalorder %s353_s11, %s353_s11 }
  0x1b   :  { %p360_p13 = por %p359_p12, %p358_p11 }
  0x1d   :  { %p361_p0 = pnand %p360_p13, %p354_p10 }
  0x1f   :  { %364 = shalt.err (!%p361_p0)
}
  0x20   :  { %49 = dma.hbm_to_vmem [thread:$0]  %s436_s3, 512, %s44_s7, [#allocation5], %s370_s24, %s370_s24, %s371_s25  }
  0x21   :  { %365 = dma.done.wait [#allocation3], 128  }
  0x22   :  { %366 = vsyncadd [#allocation3], 4294967168 }
  0x23   :  { %367 = dma.done.wait [#allocation5], 768  }
  0x24   :  { %368 = vsyncadd [#allocation5], 4294966528  ;;  %v374_v0 = vmov 0.0   ;;  %vm375_vm0 = vmmov 0   ;;  %v63_v1 = vld [vmem:[#allocation4 + $0x8] sm:$0xff]  ;;  %v62_v2 = vld [vmem:[#allocation4] sm:$0xff]  ;;  %v231_v13 = vlaneseq }
  0x25   :  { %275 = vmatprep.subr.mxu0 %v374_v0  ;;  %279 = vmatprep.mubr.msk.f32.mxu0 %vm375_vm0, %v374_v0  ;;  %v61_v3 = vld [vmem:[#allocation2] sm:$0xff]  ;;  %vm71_vm1 = vcmask 130048   ;;  %v149_v4 = vld [vmem:[#allocation6 + $0x18] sm:$0xff]  ;;  %v148_v5 = vld [vmem:[#allocation6 + $0x10] sm:$0xff]  ;;  %vm157_vm2 = vcmask 261120   ;;  %s376_s15 = smov 124  }
  0x26   :  { %282 = vmatprep.subr.mxu1 %v374_v0  ;;  %290 = vmatprep.mubr.msk.f32.mxu1 %vm375_vm0, %v374_v0  ;;  %v147_v6 = vld [vmem:[#allocation6 + $0x8] sm:$0xff]  ;;  %v146_v7 = vld [vmem:[#allocation6] sm:$0xff]  ;;  %v232_v14 = vand.u32 127, %v231_v13  ;;  %vm251_vm4 = vcmask 7168   ;;  %vm245_vm5 = vcmask 31744  }
  0x27   :  { %276 = vmatpush3.msra.mxu0 %v63_v1  ;;  %283 = vmatpush3.msra.mxu1 %v149_v4  ;;  %v263_v8 = vld [vmem:[%s435_s2] ss:$0 sm:$0xff] }
  0x28   :  { %277 = vmatprep.subr.mxu0 %v374_v0  ;;  %284 = vmatprep.subr.mxu1 %v374_v0  ;;  %v265_v15 = vld [vmem:[%s437_s4] ss:$0 sm:$0xff]  ;;  %vm233_vm3 = vcmp.lt.s32.totalorder %v232_v14, 4 }
  0x29   :  { %278 = vmatpush3.msra.mxu0 %v62_v2  ;;  %285 = vmatpush3.msra.mxu1 %v148_v5 }
  0x2a   :  { %280 = vmatmul.mubr.msk.f32.vlgmr.msra.gmra.mxu0 %vm71_vm1, %v61_v3  ;;  %286 = vmatprep.subr.mxu1 %v374_v0 }
  0x2b   :  { %287 = vmatpush3.msra.mxu1 %v147_v6 }
  0x2c   :  { %288 = vmatprep.subr.mxu1 %v374_v0 }
  0x2d   :  { %289 = vmatpush3.msra.mxu1 %v146_v7 }
  0xea   :  { %v141_v9 = vpop.f32.mrf.mxu0 }
  0xeb   :  { %v142_v10 = vadd.f32 %v263_v8, %v141_v9 }
  0xec   :  { %v281_v11 = vpop.f32.mrf.mxu0 }
  0xed   :  { %v145_v12 = vmax.f32 %v142_v10, 0.0 }
  0xef   :  { %291 = vmatmul.mubr.msk.f32.vlgmr.msra.gmra.mxu1 %vm157_vm2, %v145_v12 }
 0x1af   :  { %v227_v16 = vpop.f32.mrf.mxu1 }
 0x1b0   :  { %v228_v17 = vadd.f32 %v265_v15, %v227_v16 }
 0x1b1   :  { %v292_v18 = vpop.f32.mrf.mxu1 }
 0x1b2   :  { %248 = vrot.lane.b32.xlu1 %v228_v17, %s376_s15  ;;  %v234_v19 = vsel %vm233_vm3, %v228_v17, -inf }
 0x1b3   :  { %235 = vmax.xlane.f32.xlu0 %v234_v19 }
 0x224   :  { %v249_v20 = vpop.permute.xlu1 %248 }
 0x225   :  { %252 = vst.msk [vmem:[%s439_s6] sm:$0xff] %vm251_vm4, %v249_v20 }
 0x23c   :  { %v236_v21 = vpop.xlane.xlu0 %235 }
 0x23d   :  { %v237_v22 = vsub.f32 %v234_v19, %v236_v21 }
 0x23f   :  { %v238_v23 = vmul.f32 1.442695, %v237_v22 }
 0x241   :  { %301 = vpow2.f32 %v238_v23 }
 0x24e   :  { %v302_v24 = vpop.eup %301 }
 0x24f   :  { %v240_v25 = vsel %vm233_vm3, %v302_v24, 0.0 }
 0x250   :  { %241 = vadd.xlane.f32.xlu0 %v240_v25 }
 0x2d9   :  { %v242_v26 = vpop.xlane.xlu0 %241 }
 0x2da   :  { %303 = vrcp.f32 %v242_v26 }
 0x2e7   :  { %v304_v27 = vpop.eup %303 }
 0x2e8   :  { %v244_v28 = vmul.f32 %v304_v27, %v240_v25 }
 0x2ea   :  { %246 = vst.msk [vmem:[%s438_s5] sm:$0xff] %vm245_vm5, %v244_v28 }
 0x2eb   :  { %261 = vsyncpa [#allocation3], 1 }
 0x2ec   :  { %262 = vsyncpa [#allocation5], 1 }

</bundles_post_ra>
